<compile_context>
chip_gen: v7x
topology: tpu7x:2x2x1
jax: 0.10.0
libtpu: 0.0.40
codegen_flags: <defaults>
</compile_context>

<pallas_src>
import functools
import math

import jax
import jax.numpy as jnp
from jax.experimental import pallas as pl
from jax.experimental.pallas import tpu as pltpu

_LANE = 128


def _round_up(a: int, b: int) -> int:
    return (a + b - 1) // b * b


def _sublane_min(dtype) -> int:
    # Native vreg tile is (8, 128) for 32-bit; sub-32-bit dtypes pack along
    # sublanes: bf16 -> 16, int8/fp8 -> 32.
    return max(8, 32 // jnp.dtype(dtype).itemsize)


def _linear_kernel_f32_out(x_ref, w_ref, b_ref, o_ref):
    """float32 output: accumulate directly into the resident output block."""
    k = pl.program_id(2)

    @pl.when(k == 0)
    def _():
        o_ref[...] = jnp.zeros_like(o_ref)

    o_ref[...] += jnp.dot(
        x_ref[...], w_ref[...], preferred_element_type=jnp.float32
    )

    @pl.when(k == pl.num_programs(2) - 1)
    def _():
        o_ref[...] += b_ref[...].astype(jnp.float32)


def _linear_kernel_acc(x_ref, w_ref, b_ref, o_ref, acc_ref):
    """Narrow output dtypes: accumulate in f32 VMEM scratch, downcast once."""
    k = pl.program_id(2)

    @pl.when(k == 0)
    def _():
        acc_ref[...] = jnp.zeros_like(acc_ref)

    acc_ref[...] += jnp.dot(
        x_ref[...], w_ref[...], preferred_element_type=jnp.float32
    )

    @pl.when(k == pl.num_programs(2) - 1)
    def _():
        o_ref[...] = (acc_ref[...] + b_ref[...].astype(jnp.float32)).astype(
            o_ref.dtype
        )


@functools.partial(jax.jit, static_argnames=("n_rows", "n_cols", "bm", "tn", "tk"))
def _linear_forward_2d(x2, w_t, b2, *, n_rows, n_cols, bm, tn, tk):
    """y = x2 @ w_t + b2 with w_t already prepared as (Kp, Np), b2 as (1, Np)."""
    M, K = x2.shape
    Kp, Np = w_t.shape
    out_dtype = x2.dtype

    sub = _sublane_min(x2.dtype)
    Mp = _round_up(M, sub)
    tm = min(_round_up(bm, sub), Mp)

    # Pad x only for the sublane minimum along M and with zeros along K
    # (zeros are required so padded K blocks contribute nothing).  For
    # production shapes (M % sublane == 0, K % tk == 0) this is a no-op.
    if (Mp, Kp) != (M, K):
        x2 = jnp.pad(x2, ((0, Mp - M), (0, Kp - K)))

    grid = (pl.cdiv(Mp, tm), pl.cdiv(Np, tn), Kp // tk)

    use_direct_acc = out_dtype == jnp.float32
    kernel = _linear_kernel_f32_out if use_direct_acc else _linear_kernel_acc
    scratch = [] if use_direct_acc else [pltpu.VMEM((tm, tn), jnp.float32)]

    # VMEM budget: double-buffered inputs/output (+ optional f32 accumulator)
    # with headroom; floored at 32 MiB, capped at 64 MiB (v7x physical VMEM).
    in_item = jnp.dtype(x2.dtype).itemsize
    out_item = jnp.dtype(out_dtype).itemsize
    vmem_need = (
        2 * (tm * tk + tk * tn + tn) * in_item
        + 2 * tm * tn * out_item
        + (0 if use_direct_acc else tm * tn * 4)
    )
    vmem_limit = min(max(int(1.5 * vmem_need) + (4 << 20), 32 << 20), 64 << 20)

    cost = pl.CostEstimate(
        flops=2 * n_rows * n_cols * K,
        transcendentals=0,
        bytes_accessed=(n_rows * K + K * n_cols + n_rows * n_cols + n_cols)
        * in_item,
    )

    out_p = pl.pallas_call(
        kernel,
        out_shape=jax.ShapeDtypeStruct((Mp, Np), out_dtype),
        grid_spec=pltpu.PrefetchScalarGridSpec(
            num_scalar_prefetch=0,
            grid=grid,
            in_specs=[
                pl.BlockSpec((tm, tk), lambda i, j, k: (i, k)),  # x
                pl.BlockSpec((tk, tn), lambda i, j, k: (k, j)),  # W^T (lane-dense)
                pl.BlockSpec((1, tn), lambda i, j, k: (0, j)),   # bias
            ],
            out_specs=pl.BlockSpec((tm, tn), lambda i, j, k: (i, j)),
            scratch_shapes=scratch,
        ),
        compiler_params=pltpu.CompilerParams(
            dimension_semantics=("parallel", "parallel", "arbitrary"),
            vmem_limit_bytes=vmem_limit,
        ),
        cost_estimate=cost,
    )(x2, w_t, b2)

    return out_p[:n_rows, :n_cols]


class PallasLinear:
    """Forward-only equivalent of the UGATIT `Linear` module (nn.Linear)."""

    def __init__(self, weight, bias=None, *, bm=256, bn=512, bk=512):
        weight = jnp.asarray(weight)
        self.out_features, self.in_features = weight.shape
        N, K = self.out_features, self.in_features

        # Weight-side (static) tiling: lane-dense N tiles, big K tiles.
        Np = _round_up(N, _LANE)
        tn = min(_round_up(bn, _LANE), Np)
        # Megacore: keep >= 2 blocks across the parallel (i, j) axes even when
        # M is small, otherwise one TensorCore idles.
        if Np // tn < 2 and Np >= 2 * _LANE:
            tn = _round_up(Np // 2, _LANE)
        tk = min(_round_up(bk, _LANE), _round_up(K, _LANE))
        Kp = _round_up(K, tk)
        self._tn, self._tk, self._bm = tn, tk, bm

        # One-time weight prep (hoisted out of the per-call path): W^T padded
        # to (Kp, Np) so the forward never transposes or re-pads the weight.
        w_t = weight.T
        if (Kp, Np) != (K, N):
            w_t = jnp.pad(w_t, ((0, Kp - K), (0, Np - N)))
        if bias is None:
            bias = jnp.zeros((N,), weight.dtype)
        b2 = jnp.asarray(bias).reshape(1, N)
        if Np != N:
            b2 = jnp.pad(b2, ((0, 0), (0, Np - N)))
        self._w_t = w_t
        self._b2 = b2

    def __call__(self, x):
        *lead, K = x.shape
        assert K == self.in_features, (K, self.in_features)
        M = math.prod(lead) if lead else 1
        out2 = _linear_forward_2d(
            x.reshape(M, K),
            self._w_t,
            self._b2,
            n_rows=M,
            n_cols=self.out_features,
            bm=self._bm,
            tn=self._tn,
            tk=self._tk,
        )
        return out2.reshape(*lead, self.out_features)


def linear_reference(x, weight, bias):
    y = jnp.dot(x.astype(jnp.float32), weight.astype(jnp.float32).T)
    y = y + bias.astype(jnp.float32)
    return y.astype(x.dtype)


if __name__ == "__main__":
    BATCH, IN_FEATURES, OUT_FEATURES = 2, 32, 16

    key = jax.random.PRNGKey(0)
    kx, kw, kb = jax.random.split(key, 3)

    x = jax.random.normal(kx, (BATCH, IN_FEATURES), dtype=jnp.float32)
    # Module __init__: weight ~ N(0, 1); bias uses the nn.Linear default init
    # (host-side initialization — not part of the forward pass).
    weight = jax.random.normal(kw, (OUT_FEATURES, IN_FEATURES), dtype=jnp.float32)
    bias = jax.random.normal(kb, (OUT_FEATURES,), dtype=jnp.float32) * 0.1

    layer = PallasLinear(weight, bias)
    out = layer(x)
    jax.block_until_ready(out)

    ref = linear_reference(x, weight, bias)
    assert out.shape == (BATCH, OUT_FEATURES)
    assert jnp.allclose(out, ref, atol=1e-4, rtol=1e-4)

    print("KERNEL_OK")
</pallas_src>

<mosaic_0001>
module attributes {stable_mosaic.version = 11 : i64} {
  func.func @_linear_kernel_f32_out(%arg0: i32, %arg1: i32, %arg2: i32, %arg3: memref<8x128xf32, #tpu.memory_space<vmem>>, %arg4: memref<128x128xf32, #tpu.memory_space<vmem>>, %arg5: memref<1x128xf32, #tpu.memory_space<vmem>>, %arg6: memref<8x128xf32, #tpu.memory_space<vmem>>) attributes {dimension_semantics = [#tpu.dimension_semantics<parallel>, #tpu.dimension_semantics<parallel>, #tpu.dimension_semantics<arbitrary>], iteration_bounds = array<i64: 1, 1, 1>, scalar_prefetch = 0 : i64, scratch_operands = 0 : i64, tpu.core_type = #tpu.core_type<tc>, window_params = [{transform_indices = @transform_0, window_bounds = array<i64: 8, 128>}, {transform_indices = @transform_1, window_bounds = array<i64: 128, 128>}, {transform_indices = @transform_2, window_bounds = array<i64: 1, 128>}, {transform_indices = @transform_3, window_bounds = array<i64: 8, 128>}]} {
    %c0_i32 = arith.constant 0 : i32
    %0 = arith.cmpi eq, %arg2, %c0_i32 : i32
    %1 = arith.extui %0 : i1 to i32
    %c0_i32_0 = arith.constant 0 : i32
    %2 = arith.cmpi ne, %1, %c0_i32_0 : i32
    scf.if %2 {
      %cst_10 = arith.constant 0.000000e+00 : f32
      %12 = vector.broadcast %cst_10 : f32 to vector<8x128xf32>
      %c0_11 = arith.constant 0 : index
      %c0_12 = arith.constant 0 : index
      %13 = vector.load %arg6[%c0_11, %c0_12] : memref<8x128xf32, #tpu.memory_space<vmem>>, vector<8x128xf32>
      tpu.vector_store %arg6[%c0_11, %c0_12], %12 {strides = array<i32>} : memref<8x128xf32, #tpu.memory_space<vmem>>, vector<8x128xf32>,
    } else {
    }
    %c0 = arith.constant 0 : index
    %c0_1 = arith.constant 0 : index
    %3 = vector.load %arg6[%c0, %c0_1] : memref<8x128xf32, #tpu.memory_space<vmem>>, vector<8x128xf32>
    %c0_2 = arith.constant 0 : index
    %c0_3 = arith.constant 0 : index
    %4 = vector.load %arg3[%c0_2, %c0_3] : memref<8x128xf32, #tpu.memory_space<vmem>>, vector<8x128xf32>
    %c0_4 = arith.constant 0 : index
    %c0_5 = arith.constant 0 : index
    %5 = vector.load %arg4[%c0_4, %c0_5] : memref<128x128xf32, #tpu.memory_space<vmem>>, vector<128x128xf32>
    %cst = arith.constant dense<0.000000e+00> : vector<8x128xf32>
    %6 = tpu.matmul %4, %5, %cst {dimension_numbers = #tpu.dot_dimension_numbers<[1], [0], [0], [1], [0, 0, 1, 1], [], []>} : vector<8x128xf32>, vector<128x128xf32>, vector<8x128xf32> -> vector<8x128xf32>
    %7 = arith.addf %3, %6 : vector<8x128xf32>
    %c0_6 = arith.constant 0 : index
    %c0_7 = arith.constant 0 : index
    %8 = vector.load %arg6[%c0_6, %c0_7] : memref<8x128xf32, #tpu.memory_space<vmem>>, vector<8x128xf32>
    tpu.vector_store %arg6[%c0_6, %c0_7], %7 {strides = array<i32>} : memref<8x128xf32, #tpu.memory_space<vmem>>, vector<8x128xf32>,
    %c0_i32_8 = arith.constant 0 : i32
    %9 = arith.cmpi eq, %arg2, %c0_i32_8 : i32
    %10 = arith.extui %9 : i1 to i32
    %c0_i32_9 = arith.constant 0 : i32
    %11 = arith.cmpi ne, %10, %c0_i32_9 : i32
    scf.if %11 {
      %c0_10 = arith.constant 0 : index
      %c0_11 = arith.constant 0 : index
      %12 = vector.load %arg6[%c0_10, %c0_11] : memref<8x128xf32, #tpu.memory_space<vmem>>, vector<8x128xf32>
      %c0_12 = arith.constant 0 : index
      %c0_13 = arith.constant 0 : index
      %13 = vector.load %arg5[%c0_12, %c0_13] : memref<1x128xf32, #tpu.memory_space<vmem>>, vector<1x128xf32>
      %14 = vector.broadcast %13 : vector<1x128xf32> to vector<8x128xf32>
      %15 = arith.addf %12, %14 : vector<8x128xf32>
      %c0_14 = arith.constant 0 : index
      %c0_15 = arith.constant 0 : index
      %16 = vector.load %arg6[%c0_14, %c0_15] : memref<8x128xf32, #tpu.memory_space<vmem>>, vector<8x128xf32>
      tpu.vector_store %arg6[%c0_14, %c0_15], %15 {strides = array<i32>} : memref<8x128xf32, #tpu.memory_space<vmem>>, vector<8x128xf32>,
    } else {
    }
    return
  }
  func.func @transform_0(%arg0: i32, %arg1: i32, %arg2: i32) -> (i32, i32) {
    %c0_i32 = arith.constant 0 : i32
    return %arg0, %arg2 : i32, i32
  }
  func.func @transform_1(%arg0: i32, %arg1: i32, %arg2: i32) -> (i32, i32) {
    %c0_i32 = arith.constant 0 : i32
    return %arg2, %arg1 : i32, i32
  }
  func.func @transform_2(%arg0: i32, %arg1: i32, %arg2: i32) -> (i32, i32) {
    %c0_i32 = arith.constant 0 : i32
    %c0_i32_0 = arith.constant 0 : i32
    return %c0_i32, %arg1 : i32, i32
  }
  func.func @transform_3(%arg0: i32, %arg1: i32, %arg2: i32) -> (i32, i32) {
    %c0_i32 = arith.constant 0 : i32
    return %arg0, %arg1 : i32, i32
  }
}

</mosaic_0001>

<bundles_post_ra>
// kernel: _linear_forward_2d.1
= control target key start
LH: loop header
LB: loop body
LE: loop exit
PB: predicated region body
PF: predicated region fallthrough
CT: control target
= control target key end

     0   :  { %8 = vsyncpa [#allocation3], 0  ;;  %s248_s12 = smov [#allocation2]   ;;  %s295_s0 = inlined_call_operand.vmem [shape: f32[8,128], index: 0, kind: input, shape index: {}]   ;;  %s296_s1 = inlined_call_operand.hbm [shape: f32[128,128], index: 1, kind: input, shape index: {}]   ;;  %s297_s2 = inlined_call_operand.vmem [shape: f32[1,128], index: 2, kind: input, shape index: {}]   ;;  %s298_s3 = inlined_call_operand.vmem [shape: f32[8,128], index: 3, kind: output, shape index: {}]  }
   0x1   :  { %s16_s13 = sshll.u32 %s248_s12, 4  ;;  %s224_s16 = scalar_lea.hbm %s296_s1, 2048  ;;  %s17_s13 = int_to_ptr.vmem [resolvable:$true] %s16_s13 }
   0x2   :  { %p225_p0 = scmp.ne.s32.totalorder %s296_s1, %s224_s16  ;;  %p228_p1 = scmp.lt.u32.totalorder %s224_s16, %s296_s1 }
   0x4   :  { %p230_p2 = pnand %p228_p1, %p225_p0 }
   0x6   :  { %233 = shalt.err (!%p230_p2)
}
   0x7   :  { %s234_s21 = scalar_lea.vmem %s17_s13, 2048  ;;  %p239_p4 = scmp.lt.s32.totalorder %s17_s13, %s17_s13 }
   0x8   :  { %p235_p3 = scmp.ne.s32.totalorder %s17_s13, %s234_s21  ;;  %p240_p5 = scmp.lt.s32.totalorder %s234_s21, %s234_s21 }
   0xa   :  { %p241_p6 = por %p240_p5, %p239_p4 }
   0xc   :  { %p242_p7 = pnand %p241_p6, %p235_p3 }
   0xe   :  { %245 = shalt.err (!%p242_p7)
}
   0xf   :  { %s249_s22 = smov 128   ;;  %s250_s23 = smov 8  }
  0x10   :  { %22 = dma.hbm_to_vmem [thread:$0]  %s296_s1, 2048, %s17_s13, [#allocation3], %s249_s22, %s249_s22, %s250_s23  }
  0x11   :  { %246 = dma.done.wait [#allocation3], 2048  }
  0x12   :  { %247 = vsyncadd [#allocation3], 4294965248  ;;  %v251_v0 = vmov 0.0|0.0   ;;  %vm252_vm0 = vmmov 0   ;;  %v253_v1 = vmov 0.0   ;;  %v35_v2 = vld [vmem:[#allocation2] sm:$0xff] }
  0x13   :  { %194 = vmatprep.subr.bf16.mxu0 %v251_v0  ;;  %191 = vmatprep.mubr.msk.f32.mxu0 %vm252_vm0, %v253_v1  ;;  %v36_v3 = vld [vmem:[#allocation2 + $0x8] sm:$0xff]  ;;  %v37_v4 = vld [vmem:[#allocation2 + $0x10] sm:$0xff]  ;;  %v38_v6 = vld [vmem:[#allocation2 + $0x18] sm:$0xff] }
  0x14   :  { %v195_v5 = vpack.c.bf16 %v36_v3, %v35_v2  ;;  %v198_v7 = vpack.c.bf16 %v38_v6, %v37_v4  ;;  %v39_v8 = vld [vmem:[#allocation2 + $0x20] sm:$0xff]  ;;  %v40_v9 = vld [vmem:[#allocation2 + $0x28] sm:$0xff]  ;;  %v41_v11 = vld [vmem:[#allocation2 + $0x30] sm:$0xff] }
  0x15   :  { %v201_v10 = vpack.c.bf16 %v40_v9, %v39_v8  ;;  %v42_v12 = vld [vmem:[#allocation2 + $0x38] sm:$0xff]  ;;  %v43_v14 = vld [vmem:[#allocation2 + $0x40] sm:$0xff]  ;;  %v44_v15 = vld [vmem:[#allocation2 + $0x48] sm:$0xff] }
  0x16   :  { %196 = vmatpush3.bf16.msra.mxu0 %v195_v5  ;;  %v204_v13 = vpack.c.bf16 %v42_v12, %v41_v11  ;;  %v207_v16 = vpack.c.bf16 %v44_v15, %v43_v14  ;;  %v45_v17 = vld [vmem:[#allocation2 + $0x50] sm:$0xff]  ;;  %v46_v18 = vld [vmem:[#allocation2 + $0x58] sm:$0xff]  ;;  %v47_v20 = vld [vmem:[#allocation2 + $0x60] sm:$0xff] }
  0x17   :  { %197 = vmatprep.subr.bf16.mxu0 %v251_v0  ;;  %v210_v19 = vpack.c.bf16 %v46_v18, %v45_v17  ;;  %v48_v21 = vld [vmem:[#allocation2 + $0x68] sm:$0xff]  ;;  %v49_v23 = vld [vmem:[#allocation2 + $0x70] sm:$0xff]  ;;  %v50_v24 = vld [vmem:[#allocation2 + $0x78] sm:$0xff] }
  0x18   :  { %v213_v22 = vpack.c.bf16 %v48_v21, %v47_v20  ;;  %v216_v25 = vpack.c.bf16 %v50_v24, %v49_v23  ;;  %v34_v26 = vld [vmem:[%s295_s0] sm:$0xff] }
  0x19   :  { %v141_v28 = vld [vmem:[%s297_s2] ss:$0 sm:$0xff] }
  0x1a   :  { %199 = vmatpush3.bf16.msra.mxu0 %v198_v7 }
  0x1b   :  { %200 = vmatprep.subr.bf16.mxu0 %v251_v0 }
  0x1e   :  { %202 = vmatpush3.bf16.msra.mxu0 %v201_v10 }
  0x1f   :  { %203 = vmatprep.subr.bf16.mxu0 %v251_v0 }
  0x22   :  { %205 = vmatpush3.bf16.msra.mxu0 %v204_v13 }
  0x23   :  { %206 = vmatprep.subr.bf16.mxu0 %v251_v0 }
  0x26   :  { %208 = vmatpush3.bf16.msra.mxu0 %v207_v16 }
  0x27   :  { %209 = vmatprep.subr.bf16.mxu0 %v251_v0 }
  0x2a   :  { %211 = vmatpush3.bf16.msra.mxu0 %v210_v19 }
  0x2b   :  { %212 = vmatprep.subr.bf16.mxu0 %v251_v0 }
  0x2e   :  { %214 = vmatpush3.bf16.msra.mxu0 %v213_v22 }
  0x2f   :  { %215 = vmatprep.subr.bf16.mxu0 %v251_v0 }
  0x32   :  { %217 = vmatpush3.bf16.msra.mxu0 %v216_v25 }
  0x35   :  { %192 = vmatmul.mubr.f32.vlgmr.msra.gmra.mrb[0].mxu0 %v34_v26 }
 0x108   :  { %v117_v27 = vpop.f32.mrb[0].mxu0 }
 0x109   :  { %v193_v29 = vpop.f32.mrb[1].mxu0  ;;  %v134_v30 = vadd.f32 %v141_v28, %v117_v27 }
 0x10b   :  { %135 = vst [vmem:[%s298_s3] sm:$0xff] %v134_v30 }
 0x10c   :  { %140 = vsyncpa [#allocation3], 1 }

</bundles_post_ra>
